<compile_context>
chip_gen: v7x
topology: tpu7x:2x2x1
jax: 0.10.0
libtpu: 0.0.40
codegen_flags: <defaults>
</compile_context>

<pallas_src>
import jax
import jax.numpy as jnp
from jax.experimental import pallas as pl
from jax.experimental.pallas import tpu as pltpu

_GRAIN = 16          # row-tile granularity (bf16 packs 2 rows / sublane)
_LANE = 128          # lane width


def _round_up(v, m):
    return ((v + m - 1) // m) * m


def _cdiv(a, b):
    return -(-a // b)


def _chip_info():
    """Best-effort TPU generation detection (used only for budgets/defaults)."""
    kind = ""
    try:
        kind = jax.devices()[0].device_kind.lower()
    except Exception:
        pass
    older = any(t in kind for t in ("v2", "v3", "v4", "v5", "v6"))
    is_v7 = ("v7" in kind) or ("7x" in kind)
    return {
        # v2-v6: 128 MiB physical VMEM -> 88 MiB budget; v7x/unknown: 64 MiB -> 44 MiB.
        "vmem_budget": (88 if older else 44) * 1024 * 1024,
        "two_tensorcores": is_v7,
        "bf16_vpu": ("v6" in kind) or is_v7,
    }


# ----------------------------------------------------------------------------
# Kernels
# ----------------------------------------------------------------------------
def _make_fused_kernel(bf16_epilogue):
    """Single hidden block: whole MLP in one shot, no accumulator scratch."""
    def kernel(x_ref, w1_ref, b1_ref, w2_ref, b2_ref, o_ref):
        x = x_ref[...].astype(jnp.bfloat16)
        h = jnp.dot(x, w1_ref[...], preferred_element_type=jnp.float32)
        if bf16_epilogue:
            hb = jnp.maximum(h.astype(jnp.bfloat16) + b1_ref[...], 0.0)
        else:
            hb = jnp.maximum(h + b1_ref[...], 0.0).astype(jnp.bfloat16)
        y = jnp.dot(hb, w2_ref[...], preferred_element_type=jnp.float32) + b2_ref[...]
        o_ref[...] = y.astype(o_ref.dtype)
    return kernel


def _make_chunked_kernel(bf16_epilogue):
    """Hidden dim split over grid axis 1; partial x@W2 accumulated in f32 VMEM."""
    def kernel(x_ref, w1_ref, b1_ref, w2_ref, b2_ref, o_ref, acc_ref):
        k = pl.program_id(1)

        @pl.when(k == 0)
        def _init():
            acc_ref[...] = jnp.zeros_like(acc_ref)

        x = x_ref[...].astype(jnp.bfloat16)
        h = jnp.dot(x, w1_ref[...], preferred_element_type=jnp.float32)
        if bf16_epilogue:
            hb = jnp.maximum(h.astype(jnp.bfloat16) + b1_ref[...], 0.0)
        else:
            hb = jnp.maximum(h + b1_ref[...], 0.0).astype(jnp.bfloat16)
        acc_ref[...] += jnp.dot(hb, w2_ref[...], preferred_element_type=jnp.float32)

        @pl.when(k == pl.num_programs(1) - 1)
        def _finalize():
            o_ref[...] = (acc_ref[...] + b2_ref[...]).astype(o_ref.dtype)
    return kernel


# ----------------------------------------------------------------------------
# Sizing helpers
# ----------------------------------------------------------------------------
def _vmem_estimate(tm, in_p, hid_blk, out_p, n_k, x_bytes, out_bytes):
    wbuf = 1 if n_k == 1 else 2              # resident weights single-buffered
    b = 0
    b += wbuf * in_p * hid_blk * 2           # W1 block(s) bf16
    b += wbuf * hid_blk * out_p * 2          # W2 block(s) bf16
    b += wbuf * hid_blk * 4 + out_p * 4      # biases
    b += 2 * tm * in_p * x_bytes             # x tile (double buffered)
    b += 2 * tm * out_p * out_bytes          # out tile (double buffered)
    b += tm * hid_blk * 6                    # f32 intermediate + bf16 copy
    if n_k > 1:
        b += tm * out_p * 4                  # f32 accumulator scratch
    return b


def _select_row_tile(N, in_p, hid_blk, out_p, n_k, x_bytes, out_bytes, tm_req, info):
    tm = min(_round_up(max(tm_req, _GRAIN), _GRAIN), _round_up(N, _GRAIN))
    while tm > _GRAIN and _vmem_estimate(
            tm, in_p, hid_blk, out_p, n_k, x_bytes, out_bytes) > info["vmem_budget"]:
        tm = _round_up(tm // 2, _GRAIN)
    n_tiles = _cdiv(N, tm)
    # On v7x give the second TensorCore something to do when N is large enough.
    if info["two_tensorcores"] and n_tiles < 2 and N >= 256:
        n_tiles = 2
    tm = _round_up(_cdiv(N, n_tiles), _GRAIN)
    return tm, n_tiles


# ----------------------------------------------------------------------------
# Parameter preparation (call once; result is reusable across forward calls)
# ----------------------------------------------------------------------------
def prepare_text_encoder_params(w1, b1, w2, b2, *, bf16_epilogue=None,
                                hid_chunk=512, hid_chunk_threshold=2048):
    """w1: [in, hid]; b1: [hid]; w2: [hid, out]; b2: [out] (Linear weights transposed)."""
    assert hid_chunk % _LANE == 0
    in_dim, hid = w1.shape
    hid2, out_dim = w2.shape
    assert hid2 == hid and b1.shape == (hid,) and b2.shape == (out_dim,)

    info = _chip_info()
    if bf16_epilogue is None:
        bf16_epilogue = info["bf16_vpu"]

    in_p = _round_up(in_dim, _LANE)
    out_p = _round_up(out_dim, _LANE)
    hid_p = _round_up(hid, _LANE)
    if hid_p > hid_chunk_threshold:
        hid_blk = hid_chunk
        hid_p = _round_up(hid, hid_blk)
    else:
        hid_blk = hid_p

    b1_dtype = jnp.bfloat16 if bf16_epilogue else jnp.float32
    w1p = jnp.zeros((in_p, hid_p), jnp.bfloat16).at[:in_dim, :hid].set(
        w1.astype(jnp.bfloat16))
    w2p = jnp.zeros((hid_p, out_p), jnp.bfloat16).at[:hid, :out_dim].set(
        w2.astype(jnp.bfloat16))
    b1p = jnp.zeros((1, hid_p), b1_dtype).at[0, :hid].set(b1.astype(b1_dtype))
    b2p = jnp.zeros((1, out_p), jnp.float32).at[0, :out_dim].set(
        b2.astype(jnp.float32))

    return {
        "w1": w1p, "b1": b1p, "w2": w2p, "b2": b2p,
        "in_dim": in_dim, "hid": hid, "out_dim": out_dim,
        "in_p": in_p, "hid_p": hid_p, "hid_blk": hid_blk, "out_p": out_p,
        "bf16_epilogue": bool(bf16_epilogue),
    }


# ----------------------------------------------------------------------------
# Forward
# ----------------------------------------------------------------------------
def text_encoder_apply(params, x, *, tm=512, out_dtype=None):
    N, in_dim = x.shape
    if in_dim != params["in_dim"]:
        raise ValueError("input feature dim mismatch")

    in_p, hid_p, hid_blk, out_p = (params["in_p"], params["hid_p"],
                                   params["hid_blk"], params["out_p"])
    out_dim = params["out_dim"]
    n_k = hid_p // hid_blk
    out_dtype = jnp.dtype(x.dtype if out_dtype is None else out_dtype)
    info = _chip_info()

    # If the feature dim is misaligned we will pad+cast x to bf16 in the wrapper;
    # otherwise x is passed in its native dtype and cast inside the kernel.
    x_in_dtype = jnp.dtype(x.dtype) if in_p == in_dim else jnp.dtype(jnp.bfloat16)
    tm_eff, n_tiles = _select_row_tile(
        N, in_p, hid_blk, out_p, n_k, x_in_dtype.itemsize, out_dtype.itemsize,
        tm, info)
    n_pad = n_tiles * tm_eff

    if n_pad != N or in_p != in_dim:
        xin = jnp.zeros((n_pad, in_p), jnp.bfloat16).at[:N, :in_dim].set(
            x.astype(jnp.bfloat16))
    else:
        xin = x  # no wrapper copy; kernel casts to bf16 on the fly

    est = _vmem_estimate(tm_eff, in_p, hid_blk, out_p, n_k,
                         jnp.dtype(xin.dtype).itemsize, out_dtype.itemsize)
    vmem_limit = int(min(info["vmem_budget"], max(32 << 20, est + (8 << 20))))

    resident = dict(pipeline_mode=pl.Buffered(1))  # constant index_map operands

    if n_k == 1:
        kernel = _make_fused_kernel(params["bf16_epilogue"])
        grid = (n_tiles,)
        in_specs = [
            pl.BlockSpec((tm_eff, in_p), lambda i: (i, 0)),
            pl.BlockSpec((in_p, hid_blk), lambda i: (0, 0), **resident),
            pl.BlockSpec((1, hid_blk), lambda i: (0, 0), **resident),
            pl.BlockSpec((hid_blk, out_p), lambda i: (0, 0), **resident),
            pl.BlockSpec((1, out_p), lambda i: (0, 0), **resident),
        ]
        out_specs = pl.BlockSpec((tm_eff, out_p), lambda i: (i, 0))
        scratch = []
        dims = ("parallel",)
    else:
        kernel = _make_chunked_kernel(params["bf16_epilogue"])
        grid = (n_tiles, n_k)
        in_specs = [
            pl.BlockSpec((tm_eff, in_p), lambda i, k: (i, 0)),
            pl.BlockSpec((in_p, hid_blk), lambda i, k: (0, k)),
            pl.BlockSpec((1, hid_blk), lambda i, k: (0, k)),
            pl.BlockSpec((hid_blk, out_p), lambda i, k: (k, 0)),
            pl.BlockSpec((1, out_p), lambda i, k: (0, 0), **resident),
        ]
        out_specs = pl.BlockSpec((tm_eff, out_p), lambda i, k: (i, 0))
        scratch = [pltpu.VMEM((tm_eff, out_p), jnp.float32)]
        dims = ("parallel", "arbitrary")

    yp = pl.pallas_call(
        kernel,
        out_shape=jax.ShapeDtypeStruct((n_pad, out_p), out_dtype),
        grid_spec=pltpu.PrefetchScalarGridSpec(
            num_scalar_prefetch=0,
            grid=grid,
            in_specs=in_specs,
            out_specs=out_specs,
            scratch_shapes=scratch),
        compiler_params=pltpu.CompilerParams(
            dimension_semantics=dims,
            vmem_limit_bytes=vmem_limit),
        # TODO(synk): for extremely large in_dim, add a third (reduction) grid
        # axis over in_dim chunks as well; currently W1's K dim stays resident.
    )(xin, params["w1"], params["b1"], params["w2"], params["b2"])

    if n_pad != N or out_p != out_dim:
        yp = yp[:N, :out_dim]
    return yp


def text_encoder_forward(x, w1, b1, w2, b2, *, tm=512, out_dtype=None):
    """Convenience one-shot wrapper (prefer prepare_* + apply for repeated calls)."""
    params = prepare_text_encoder_params(w1, b1, w2, b2)
    return text_encoder_apply(params, x, tm=tm, out_dtype=out_dtype)


def _reference(x, w1, b1, w2, b2):
    h = jnp.maximum(x @ w1 + b1, 0.0)
    return h @ w2 + b2


if __name__ == "__main__":
    key = jax.random.PRNGKey(0)

    # --- Test 1: shapes consistent with TextEncoder(in_dim, hid_dim, out_dim) ---
    N, in_dim, hid_dim, out_dim = 16, 32, 64, 16
    kx, kw1, kb1, kw2, kb2, key = jax.random.split(key, 6)
    x = jax.random.normal(kx, (N, in_dim), dtype=jnp.float32)
    w1 = jax.random.normal(kw1, (in_dim, hid_dim), dtype=jnp.float32) * 0.1
    b1 = jax.random.normal(kb1, (hid_dim,), dtype=jnp.float32) * 0.1
    w2 = jax.random.normal(kw2, (hid_dim, out_dim), dtype=jnp.float32) * 0.1
    b2 = jax.random.normal(kb2, (out_dim,), dtype=jnp.float32) * 0.1

    params = prepare_text_encoder_params(w1, b1, w2, b2)   # pad/cast weights once
    out = jax.block_until_ready(text_encoder_apply(params, x))
    ref = _reference(x, w1, b1, w2, b2)
    assert out.shape == (N, out_dim)
    # bf16 MXU operands + f32 accumulation -> loose tolerance vs f32 reference.
    assert jnp.allclose(out, ref, atol=2e-2, rtol=2e-2), "mismatch vs reference (fused)"

    # Convenience wrapper path.
    out_w = jax.block_until_ready(text_encoder_forward(x, w1, b1, w2, b2))
    assert jnp.allclose(out_w, ref, atol=2e-2, rtol=2e-2), "mismatch vs reference (wrapper)"

    # --- Test 2: aligned input + forced hidden-dim chunking (chunked kernel path) ---
    N2, in2, hid2, out2 = 16, 128, 256, 64
    kx2, kw1b, kb1b, kw2b, kb2b, key = jax.random.split(key, 6)
    x2 = jax.random.normal(kx2, (N2, in2), dtype=jnp.float32)
    w1b = jax.random.normal(kw1b, (in2, hid2), dtype=jnp.float32) * 0.1
    b1b = jax.random.normal(kb1b, (hid2,), dtype=jnp.float32) * 0.1
    w2b = jax.random.normal(kw2b, (hid2, out2), dtype=jnp.float32) * 0.1
    b2b = jax.random.normal(kb2b, (out2,), dtype=jnp.float32) * 0.1

    params2 = prepare_text_encoder_params(
        w1b, b1b, w2b, b2b, hid_chunk=128, hid_chunk_threshold=128)
    out2_k = jax.block_until_ready(text_encoder_apply(params2, x2))
    ref2 = _reference(x2, w1b, b1b, w2b, b2b)
    assert out2_k.shape == (N2, out2)
    assert jnp.allclose(out2_k, ref2, atol=4e-2, rtol=4e-2), "mismatch vs reference (chunked)"

    print("KERNEL_OK")
</pallas_src>

<mosaic_0001>
module attributes {stable_mosaic.version = 11 : i64} {
  func.func @kernel(%arg0: i32, %arg1: memref<16x128xbf16, #tpu.memory_space<vmem>>, %arg2: memref<128x128xbf16, #tpu.memory_space<vmem>>, %arg3: memref<1x128xf32, #tpu.memory_space<vmem>>, %arg4: memref<128x128xbf16, #tpu.memory_space<vmem>>, %arg5: memref<1x128xf32, #tpu.memory_space<vmem>>, %arg6: memref<16x128xf32, #tpu.memory_space<vmem>>) attributes {dimension_semantics = [#tpu.dimension_semantics<parallel>], iteration_bounds = array<i64: 1>, scalar_prefetch = 0 : i64, scratch_operands = 0 : i64, tpu.core_type = #tpu.core_type<tc>, window_params = [{transform_indices = @transform_0, window_bounds = array<i64: 16, 128>}, {pipeline_mode = #tpu.pipeline_mode<synchronous>, transform_indices = @transform_1, window_bounds = array<i64: 128, 128>}, {pipeline_mode = #tpu.pipeline_mode<synchronous>, transform_indices = @transform_2, window_bounds = array<i64: 1, 128>}, {pipeline_mode = #tpu.pipeline_mode<synchronous>, transform_indices = @transform_3, window_bounds = array<i64: 128, 128>}, {pipeline_mode = #tpu.pipeline_mode<synchronous>, transform_indices = @transform_4, window_bounds = array<i64: 1, 128>}, {transform_indices = @transform_5, window_bounds = array<i64: 16, 128>}]} {
    %c0 = arith.constant 0 : index
    %c0_0 = arith.constant 0 : index
    %0 = vector.load %arg1[%c0, %c0_0] : memref<16x128xbf16, #tpu.memory_space<vmem>>, vector<16x128xbf16>
    %c0_1 = arith.constant 0 : index
    %c0_2 = arith.constant 0 : index
    %1 = vector.load %arg2[%c0_1, %c0_2] : memref<128x128xbf16, #tpu.memory_space<vmem>>, vector<128x128xbf16>
    %cst = arith.constant dense<0.000000e+00> : vector<16x128xf32>
    %2 = tpu.matmul %0, %1, %cst {dimension_numbers = #tpu.dot_dimension_numbers<[1], [0], [0], [1], [0, 0, 1, 1], [], []>} : vector<16x128xbf16>, vector<128x128xbf16>, vector<16x128xf32> -> vector<16x128xf32>
    %c0_3 = arith.constant 0 : index
    %c0_4 = arith.constant 0 : index
    %3 = vector.load %arg3[%c0_3, %c0_4] : memref<1x128xf32, #tpu.memory_space<vmem>>, vector<1x128xf32>
    %4 = vector.broadcast %3 : vector<1x128xf32> to vector<16x128xf32>
    %5 = arith.addf %2, %4 : vector<16x128xf32>
    %cst_5 = arith.constant 0.000000e+00 : f32
    %6 = vector.broadcast %cst_5 : f32 to vector<16x128xf32>
    %7 = arith.maximumf %5, %6 : vector<16x128xf32>
    %8 = arith.truncf %7 : vector<16x128xf32> to vector<16x128xbf16>
    %c0_6 = arith.constant 0 : index
    %c0_7 = arith.constant 0 : index
    %9 = vector.load %arg4[%c0_6, %c0_7] : memref<128x128xbf16, #tpu.memory_space<vmem>>, vector<128x128xbf16>
    %cst_8 = arith.constant dense<0.000000e+00> : vector<16x128xf32>
    %10 = tpu.matmul %8, %9, %cst_8 {dimension_numbers = #tpu.dot_dimension_numbers<[1], [0], [0], [1], [0, 0, 1, 1], [], []>} : vector<16x128xbf16>, vector<128x128xbf16>, vector<16x128xf32> -> vector<16x128xf32>
    %c0_9 = arith.constant 0 : index
    %c0_10 = arith.constant 0 : index
    %11 = vector.load %arg5[%c0_9, %c0_10] : memref<1x128xf32, #tpu.memory_space<vmem>>, vector<1x128xf32>
    %12 = vector.broadcast %11 : vector<1x128xf32> to vector<16x128xf32>
    %13 = arith.addf %10, %12 : vector<16x128xf32>
    %c0_11 = arith.constant 0 : index
    %c0_12 = arith.constant 0 : index
    %14 = vector.load %arg6[%c0_11, %c0_12] : memref<16x128xf32, #tpu.memory_space<vmem>>, vector<16x128xf32>
    tpu.vector_store %arg6[%c0_11, %c0_12], %13 {strides = array<i32>} : memref<16x128xf32, #tpu.memory_space<vmem>>, vector<16x128xf32>,
    return
  }
  func.func @transform_0(%arg0: i32) -> (i32, i32) {
    %c0_i32 = arith.constant 0 : i32
    %c0_i32_0 = arith.constant 0 : i32
    return %arg0, %c0_i32 : i32, i32
  }
  func.func @transform_1(%arg0: i32) -> (i32, i32) {
    %c0_i32 = arith.constant 0 : i32
    %c0_i32_0 = arith.constant 0 : i32
    %c0_i32_1 = arith.constant 0 : i32
    return %c0_i32, %c0_i32_0 : i32, i32
  }
  func.func @transform_2(%arg0: i32) -> (i32, i32) {
    %c0_i32 = arith.constant 0 : i32
    %c0_i32_0 = arith.constant 0 : i32
    %c0_i32_1 = arith.constant 0 : i32
    return %c0_i32, %c0_i32_0 : i32, i32
  }
  func.func @transform_3(%arg0: i32) -> (i32, i32) {
    %c0_i32 = arith.constant 0 : i32
    %c0_i32_0 = arith.constant 0 : i32
    %c0_i32_1 = arith.constant 0 : i32
    return %c0_i32, %c0_i32_0 : i32, i32
  }
  func.func @transform_4(%arg0: i32) -> (i32, i32) {
    %c0_i32 = arith.constant 0 : i32
    %c0_i32_0 = arith.constant 0 : i32
    %c0_i32_1 = arith.constant 0 : i32
    return %c0_i32, %c0_i32_0 : i32, i32
  }
  func.func @transform_5(%arg0: i32) -> (i32, i32) {
    %c0_i32 = arith.constant 0 : i32
    %c0_i32_0 = arith.constant 0 : i32
    return %arg0, %c0_i32 : i32, i32
  }
}

</mosaic_0001>

<bundles_post_ra>
// kernel: tpu_custom_call.1
= control target key start
LH: loop header
LB: loop body
LE: loop exit
PB: predicated region body
PF: predicated region fallthrough
CT: control target
= control target key end

     0   :  { %10 = vsyncpa [#allocation3], 0  ;;  %s626_s0 = inlined_call_operand.hbm [shape: bf16[16,128], index: 0, kind: input, shape index: {}]   ;;  %s627_s1 = inlined_call_operand.hbm [shape: bf16[128,128], index: 1, kind: input, shape index: {}]   ;;  %s628_s2 = inlined_call_operand.vmem [shape: f32[1,128], index: 2, kind: input, shape index: {}]   ;;  %s629_s3 = inlined_call_operand.hbm [shape: bf16[128,128], index: 3, kind: input, shape index: {}]   ;;  %s630_s4 = inlined_call_operand.vmem [shape: f32[1,128], index: 4, kind: input, shape index: {}]   ;;  %s631_s5 = inlined_call_operand.hbm [shape: f32[16,128], index: 5, kind: output, shape index: {}]  }
   0x1   :  { %11 = vsyncpa [#allocation6], 0 }
   0x2   :  { %12 = vsyncpa [#allocation4], 0  ;;  %s516_s18 = smov [#allocation5]   ;;  %s517_s20 = smov [#allocation2]  }
   0x3   :  { %s30_s19 = sshll.u32 %s516_s18, 4  ;;  %s18_s21 = sshll.u32 %s517_s20, 4  ;;  %s31_s19 = int_to_ptr.vmem [resolvable:$true] %s30_s19  ;;  %s556_s21 = int_to_ptr.vmem [resolvable:$true] %s18_s21 }
   0x4   :  { %s422_s24 = scalar_lea.hbm %s627_s1, 1024 }
   0x5   :  { %p423_p0 = scmp.ne.s32.totalorder %s627_s1, %s422_s24  ;;  %p426_p1 = scmp.lt.u32.totalorder %s422_s24, %s627_s1 }
   0x7   :  { %p428_p2 = pnand %p426_p1, %p423_p0 }
   0x9   :  { %431 = shalt.err (!%p428_p2)
}
   0xa   :  { %s432_s29 = scalar_lea.vmem %s31_s19, 1024  ;;  %p437_p4 = scmp.lt.s32.totalorder %s31_s19, %s31_s19 }
   0xb   :  { %p433_p3 = scmp.ne.s32.totalorder %s31_s19, %s432_s29  ;;  %p438_p5 = scmp.lt.s32.totalorder %s432_s29, %s432_s29 }
   0xd   :  { %p439_p6 = por %p438_p5, %p437_p4 }
   0xf   :  { %p440_p7 = pnand %p439_p6, %p433_p3 }
  0x11   :  { %443 = shalt.err (!%p440_p7)
}
  0x12   :  { %s518_s30 = smov 64   ;;  %s519_s6 = smov 4  }
  0x13   :  { %36 = dma.hbm_to_vmem [thread:$0]  %s627_s1, 1024, %s31_s19, [#allocation6], %s518_s30, %s518_s30, %s519_s6  }
  0x14   :  { %s444_s11 = scalar_lea.hbm %s626_s0, 128 }
  0x15   :  { %p445_p8 = scmp.ne.s32.totalorder %s626_s0, %s444_s11  ;;  %p448_p9 = scmp.lt.u32.totalorder %s444_s11, %s626_s0 }
  0x17   :  { %p450_p10 = pnand %p448_p9, %p445_p8 }
  0x19   :  { %453 = shalt.err (!%p450_p10)
}
  0x1a   :  { %s454_s16 = scalar_lea.vmem %s556_s21, 128  ;;  %p459_p12 = scmp.lt.s32.totalorder %s556_s21, %s556_s21 }
  0x1b   :  { %p455_p11 = scmp.ne.s32.totalorder %s556_s21, %s454_s16  ;;  %p460_p13 = scmp.lt.s32.totalorder %s454_s16, %s454_s16 }
  0x1d   :  { %p461_p0 = por %p460_p13, %p459_p12 }
  0x1f   :  { %p462_p1 = pnand %p461_p0, %p455_p11 }
  0x21   :  { %465 = shalt.err (!%p462_p1)
}
  0x22   :  { %24 = dma.hbm_to_vmem [thread:$0]  %s626_s0, 128, %s556_s21, [#allocation3], %s518_s30, %s518_s30, %s519_s6  }
  0x23   :  { %s520_s18 = smov [#allocation7]   ;;  %s466_s23 = scalar_lea.hbm %s629_s3, 1024 }
  0x24   :  { %s44_s19 = sshll.u32 %s520_s18, 4  ;;  %p467_p2 = scmp.ne.s32.totalorder %s629_s3, %s466_s23  ;;  %s45_s19 = int_to_ptr.vmem [resolvable:$true] %s44_s19 }
  0x25   :  { %p470_p3 = scmp.lt.u32.totalorder %s466_s23, %s629_s3 }
  0x27   :  { %p472_p4 = pnand %p470_p3, %p467_p2 }
  0x29   :  { %475 = shalt.err (!%p472_p4)
}
  0x2a   :  { %s476_s28 = scalar_lea.vmem %s45_s19, 1024  ;;  %p481_p6 = scmp.lt.s32.totalorder %s45_s19, %s45_s19 }
  0x2b   :  { %p477_p5 = scmp.ne.s32.totalorder %s45_s19, %s476_s28  ;;  %p482_p7 = scmp.lt.s32.totalorder %s476_s28, %s476_s28 }
  0x2d   :  { %p483_p8 = por %p482_p7, %p481_p6 }
  0x2f   :  { %p484_p9 = pnand %p483_p8, %p477_p5 }
  0x31   :  { %487 = shalt.err (!%p484_p9)
}
  0x32   :  { %50 = dma.hbm_to_vmem [thread:$0]  %s629_s3, 1024, %s45_s19, [#allocation6], %s518_s30, %s518_s30, %s519_s6  }
  0x33   :  { %510 = dma.done.wait [#allocation3], 128  }
  0x34   :  { %511 = vsyncadd [#allocation3], 4294967168 }
  0x35   :  { %512 = dma.done.wait [#allocation6], 2048  }
  0x36   :  { %513 = vsyncadd [#allocation6], 4294965248  ;;  %v521_v0 = vmov 0.0   ;;  %vm522_vm0 = vmmov 0   ;;  %v405_v1 = vld [vmem:[#allocation5] sm:$0xff]   ;;  %v406_v2 = vld [vmem:[#allocation5 + $0x8] sm:$0xff]  }
  0x37   :  { %355 = vmatprep.subr.bf16.mxu0 %v521_v0  ;;  %371 = vmatprep.mubr.msk.bf16.mxu0 %vm522_vm0, %v521_v0  ;;  %v407_v3 = vld [vmem:[#allocation5 + $0x10] sm:$0xff]   ;;  %v414_v4 = vld [vmem:[#allocation7] sm:$0xff]   ;;  %v408_v5 = vld [vmem:[#allocation5 + $0x18] sm:$0xff]   ;;  %s523_s7 = smov [#allocation8]  }
  0x38   :  { %375 = vmatprep.subr.bf16.mxu1 %v521_v0  ;;  %391 = vmatprep.mubr.msk.bf16.mxu1 %vm522_vm0, %v521_v0  ;;  %v415_v6 = vld [vmem:[#allocation7 + $0x8] sm:$0xff]   ;;  %v409_v7 = vld [vmem:[#allocation5 + $0x20] sm:$0xff]   ;;  %v416_v8 = vld [vmem:[#allocation7 + $0x10] sm:$0xff]   ;;  %s305_s8 = sshll.u32 %s523_s7, 4  ;;  %s306_s8 = int_to_ptr.vmem [resolvable:$true] %s305_s8 }
  0x39   :  { %356 = vmatpush3.bf16.msra.mxu0 %v405_v1  ;;  %376 = vmatpush3.bf16.msra.mxu1 %v414_v4  ;;  %v410_v9 = vld [vmem:[#allocation5 + $0x28] sm:$0xff]   ;;  %v417_v10 = vld [vmem:[#allocation7 + $0x18] sm:$0xff]   ;;  %v411_v11 = vld [vmem:[#allocation5 + $0x30] sm:$0xff]   ;;  %p493_p11 = scmp.lt.s32.totalorder %s306_s8, %s306_s8 }
  0x3a   :  { %357 = vmatprep.subr.bf16.mxu0 %v521_v0  ;;  %377 = vmatprep.subr.bf16.mxu1 %v521_v0  ;;  %v418_v12 = vld [vmem:[#allocation7 + $0x20] sm:$0xff]   ;;  %v412_v13 = vld [vmem:[#allocation5 + $0x38] sm:$0xff]   ;;  %v419_v14 = vld [vmem:[#allocation7 + $0x28] sm:$0xff]  }
  0x3b   :  { %v413_v15 = vld [vmem:[#allocation2] sm:$0xff]   ;;  %v420_v16 = vld [vmem:[#allocation7 + $0x30] sm:$0xff]  }
  0x3c   :  { %v421_v17 = vld [vmem:[#allocation7 + $0x38] sm:$0xff]  }
  0x3d   :  { %358 = vmatpush3.bf16.msra.mxu0 %v406_v2  ;;  %378 = vmatpush3.bf16.msra.mxu1 %v415_v6  ;;  %v318_v18 = vld [vmem:[%s628_s2] ss:$0 sm:$0xff]  ;;  %s488_s2 = scalar_lea.vmem %s306_s8, 256 }
  0x3e   :  { %359 = vmatprep.subr.bf16.mxu0 %v521_v0  ;;  %379 = vmatprep.subr.bf16.mxu1 %v521_v0  ;;  %v328_v28 = vld [vmem:[%s630_s4] ss:$0 sm:$0xff]  ;;  %p489_p10 = scmp.ne.s32.totalorder %s306_s8, %s488_s2  ;;  %p494_p12 = scmp.lt.s32.totalorder %s488_s2, %s488_s2 }
  0x40   :  { %p495_p13 = por %p494_p12, %p493_p11 }
  0x41   :  { %360 = vmatpush3.bf16.msra.mxu0 %v407_v3  ;;  %380 = vmatpush3.bf16.msra.mxu1 %v416_v8 }
  0x42   :  { %361 = vmatprep.subr.bf16.mxu0 %v521_v0  ;;  %381 = vmatprep.subr.bf16.mxu1 %v521_v0  ;;  %p496_p0 = pnand %p495_p13, %p489_p10 }
  0x45   :  { %362 = vmatpush3.bf16.msra.mxu0 %v408_v5  ;;  %382 = vmatpush3.bf16.msra.mxu1 %v417_v10 }
  0x46   :  { %363 = vmatprep.subr.bf16.mxu0 %v521_v0  ;;  %383 = vmatprep.subr.bf16.mxu1 %v521_v0 }
  0x49   :  { %364 = vmatpush3.bf16.msra.mxu0 %v409_v7  ;;  %384 = vmatpush3.bf16.msra.mxu1 %v418_v12 }
  0x4a   :  { %365 = vmatprep.subr.bf16.mxu0 %v521_v0  ;;  %385 = vmatprep.subr.bf16.mxu1 %v521_v0 }
  0x4d   :  { %366 = vmatpush3.bf16.msra.mxu0 %v410_v9  ;;  %386 = vmatpush3.bf16.msra.mxu1 %v419_v14 }
  0x4e   :  { %367 = vmatprep.subr.bf16.mxu0 %v521_v0  ;;  %387 = vmatprep.subr.bf16.mxu1 %v521_v0 }
  0x51   :  { %368 = vmatpush3.bf16.msra.mxu0 %v411_v11  ;;  %388 = vmatpush3.bf16.msra.mxu1 %v420_v16 }
  0x52   :  { %369 = vmatprep.subr.bf16.mxu0 %v521_v0  ;;  %389 = vmatprep.subr.bf16.mxu1 %v521_v0 }
  0x55   :  { %370 = vmatpush3.bf16.msra.mxu0 %v412_v13  ;;  %390 = vmatpush3.bf16.msra.mxu1 %v421_v17 }
  0x58   :  { %372 = vmatmul.mubr.bf16.vlgmr.msra.gmra.mrb[0].mxu0 %v413_v15 }
 0x12b   :  { %v176_v19 = vpop.f32.mrb[0].mxu0 }
 0x12c   :  { %v177_v20 = vadd.f32 %v318_v18, %v176_v19  ;;  %v373_v21 = vpop.f32.mrb[1].mxu0 }
 0x12d   :  { %v179_v22 = vpop.f32.mrb[2].mxu0 }
 0x12e   :  { %v180_v23 = vadd.f32 %v318_v18, %v179_v22  ;;  %v374_v24 = vpop.f32.mrb[3].mxu0  ;;  %v183_v25 = vmax.f32 %v177_v20, 0.0 }
 0x130   :  { %v184_v26 = vmax.f32 %v180_v23, 0.0 }
 0x132   :  { %v185_v27 = vpack.c.bf16 %v184_v26, %v183_v25 }
 0x134   :  { %392 = vmatmul.mubr.bf16.vlgmr.msra.gmra.mrb[0].mxu1 %v185_v27 }
 0x207   :  { %v291_v29 = vpop.f32.mrb[0].mxu1 }
 0x208   :  { %v292_v30 = vadd.f32 %v328_v28, %v291_v29  ;;  %v393_v31 = vpop.f32.mrb[1].mxu1 }
 0x209   :  { %v294_v32 = vpop.f32.mrb[2].mxu1 }
 0x20a   :  { %298 = vst [vmem:[#allocation8] sm:$0xff] %v292_v30  ;;  %v295_v33 = vadd.f32 %v328_v28, %v294_v32  ;;  %v394_v34 = vpop.f32.mrb[3].mxu1 }
 0x20c   :  { %299 = vst [vmem:[#allocation8 + $0x8] sm:$0xff] %v295_v33 }
 0x20d   :  { %499 = shalt.err (!%p496_p0)
}
 0x20e   :  { %s500_s10 = scalar_lea.hbm %s631_s5, 256 }
 0x20f   :  { %p501_p1 = scmp.ne.s32.totalorder %s631_s5, %s500_s10  ;;  %p504_p2 = scmp.lt.u32.totalorder %s500_s10, %s631_s5 }
 0x211   :  { %p506_p3 = pnand %p504_p2, %p501_p1 }
 0x213   :  { %509 = shalt.err (!%p506_p3)
}
 0x214   :  { %s524_s15 = smov 128   ;;  %s525_s16 = smov 8  }
 0x215   :  { %311 = dma.vmem_to_hbm [thread:$0]  %s306_s8, 256, %s631_s5, [#allocation4], %s524_s15, %s524_s15, %s525_s16  }
 0x216   :  { %514 = dma.done.wait [#allocation4], 256  }
 0x217   :  { %515 = vsyncadd [#allocation4], 4294967040 }
 0x218   :  { %315 = vsyncpa [#allocation3], 1 }
 0x219   :  { %316 = vsyncpa [#allocation6], 1 }
 0x21a   :  { %317 = vsyncpa [#allocation4], 1 }

</bundles_post_ra>
